<compile_context>
chip_gen: v5e
topology: v5e:2x2
jax: 0.10.0
libtpu: 0.0.40
codegen_flags: <defaults>
</compile_context>

<pallas_src>
import functools

import jax
import jax.numpy as jnp
from jax.experimental import pallas as pl
from jax.experimental.pallas import tpu as pltpu

BN_EPS = 1e-5
TM_TARGET = 1024                      # batch-tile target (amortize ~0.35us/step)
V7X_SAFE_VMEM = 48 * 1024 * 1024      # budget that still fits v7x's 64 MiB VMEM


def _round_up(x, m):
    return ((x + m - 1) // m) * m


def _cdiv(a, b):
    return -(-a // b)


def _choose_tm(B, tm_target=TM_TARGET):
    """Pick the batch tile.

    - Big enough to amortize per-grid-step overhead (target tm_target rows).
    - >= 2 grid steps when the batch allows, so v7x megacore splits the
      "parallel" axis across both TensorCores (free on v5e/v6e).
    - Rounded to 16 (bf16 sublane packing); bumped to 128/256 MXU M-pass
      alignment only when it costs little extra batch padding.
    """
    steps = max(1, _cdiv(B, tm_target))
    if steps == 1 and B >= 512:
        steps = 2
    tm = _round_up(_cdiv(B, steps), 16)
    for align in (256, 128):
        if tm >= align:
            aligned = _round_up(tm, align)
            if aligned - tm <= max(16, tm // 16):   # accept if <~6% extra rows
                tm = aligned
            break
    return tm


def dnn_kernel(x_ref, w1_ref, b1_ref, w2_ref, b2_ref, o_ref):
    # fc1 (BN already folded into w1/b1). x arrives in f32; the f32->bf16 cast
    # runs on the VPU under MXU/DMA slack instead of a separate XLA HBM pass.
    x = x_ref[...].astype(jnp.bfloat16)
    h = jnp.dot(x, w1_ref[...], preferred_element_type=jnp.float32)
    # bias + ReLU in f32 on the accumulator (cheap VPU work, exact on v5e too)
    h = jnp.maximum(h + b1_ref[...], 0.0)
    # Dropout: identity (eval mode)
    # fc2: cast activations to bf16 for the MXU, accumulate in f32
    out = jnp.dot(h.astype(jnp.bfloat16), w2_ref[...],
                  preferred_element_type=jnp.float32)
    o_ref[...] = out + b2_ref[...]


def prepare_params(params):
    """One-time parameter prep (hoisted off the per-call path).

    Folds BatchNorm1d (eval, running stats) into fc1, casts weights to bf16,
    and pads fc2's output lanes to a multiple of 128 (lane-dense stores, full
    MXU columns). Returns ((w1f, b1f, w2p, b2p), output_dim).
    """
    w1, b1, gamma, beta, mean, var, w2, b2 = params
    scale = gamma * jax.lax.rsqrt(var + BN_EPS)            # (1, H)
    w1f = (w1 * scale).astype(jnp.bfloat16)                # per-column scale
    b1f = ((b1 - mean) * scale + beta).astype(jnp.float32)
    O = w2.shape[1]
    O_pad = _round_up(O, 128)
    w2p = jnp.pad(w2, ((0, 0), (0, O_pad - O))).astype(jnp.bfloat16)
    b2p = jnp.pad(b2, ((0, 0), (0, O_pad - O))).astype(jnp.float32)
    return (w1f, b1f, w2p, b2p), O


def _const_spec(shape, single_buffer):
    """BlockSpec for a grid-invariant (VMEM-resident) operand."""
    index_map = lambda i: (0, 0)
    if single_buffer:
        # Never changes across the grid -> no point double-buffering it.
        return pl.BlockSpec(shape, index_map, pipeline_mode=pl.Buffered(1))
    return pl.BlockSpec(shape, index_map)


@functools.partial(jax.jit,
                   static_argnames=("out_dim", "tm", "single_buffer_weights"))
def torch_dnn_forward(x, prepared, *, out_dim, tm=None,
                      single_buffer_weights=True):
    """Fused eval-mode forward pass of TorchDNN (num_layers=2, batch_norm=True).

    `prepared` is the output of prepare_params() (BN-folded / bf16 / padded).
    """
    w1f, b1f, w2p, b2p = prepared
    B, D = x.shape
    H = w1f.shape[1]
    O_pad = w2p.shape[1]

    # ---- Batch tiling --------------------------------------------------------
    if tm is None:
        tm = _choose_tm(B)
    B_pad = _round_up(B, tm)
    xp = x if B_pad == B else jnp.pad(x, ((0, B_pad - B), (0, 0)))
    grid = (B_pad // tm,)

    # ---- VMEM budget (generation-aware: v7x is the tightest at 64 MiB) ------
    weight_bufs = 1 if single_buffer_weights else 2
    resident = weight_bufs * (2 * (D * H + H * O_pad) + 4 * (H + O_pad))
    per_step = 2 * tm * D * 4 + 2 * tm * O_pad * 4      # x (f32) + out (f32), 2 bufs
    vmem_needed = resident + per_step
    # TODO(synk): add an H-tiled fallback (grid axis over H marked "arbitrary"
    # with an f32 VMEM accumulator) instead of asserting when the resident
    # weights outgrow the v7x budget.
    assert vmem_needed <= V7X_SAFE_VMEM, (
        f"resident weights + pipelined tiles ({vmem_needed} B) exceed the "
        f"v7x-safe VMEM budget ({V7X_SAFE_VMEM} B); tile over H instead")
    vmem_limit = min(V7X_SAFE_VMEM,
                     max(32 * 1024 * 1024,
                         _round_up(vmem_needed * 5 // 4, 1 << 20)))

    cost = pl.CostEstimate(
        flops=2 * B_pad * (D * H + H * O_pad),
        transcendentals=0,
        bytes_accessed=(B_pad * D * 4                     # x read (f32)
                        + 2 * (D * H + H * O_pad)         # bf16 weights
                        + 4 * (H + O_pad)                 # f32 biases
                        + B_pad * O_pad * 4),             # f32 output
    )

    out = pl.pallas_call(
        dnn_kernel,
        out_shape=jax.ShapeDtypeStruct((B_pad, O_pad), jnp.float32),
        grid=grid,
        in_specs=[
            pl.BlockSpec((tm, D), lambda i: (i, 0)),         # x tile (pipelined)
            _const_spec((D, H), single_buffer_weights),       # w1 resident
            _const_spec((1, H), single_buffer_weights),       # b1 resident
            _const_spec((H, O_pad), single_buffer_weights),   # w2 resident
            _const_spec((1, O_pad), single_buffer_weights),   # b2 resident
        ],
        out_specs=pl.BlockSpec((tm, O_pad), lambda i: (i, 0)),
        compiler_params=pltpu.CompilerParams(
            dimension_semantics=("parallel",),               # 2 TCs on v7x
            vmem_limit_bytes=vmem_limit,
        ),
        cost_estimate=cost,
    )(xp, w1f, b1f, w2p, b2p)

    return out[:B, :out_dim]


def init_params(key, input_dim, hidden_dim, output_dim):
    """Deterministic parameter init mirroring nn.Linear / nn.BatchNorm1d shapes."""
    k1, k2, k3, k4 = jax.random.split(key, 4)
    lim1 = 1.0 / jnp.sqrt(input_dim)
    lim2 = 1.0 / jnp.sqrt(hidden_dim)
    # Stored pre-transposed: [in, out] (PyTorch stores [out, in]).
    w1 = jax.random.uniform(k1, (input_dim, hidden_dim), jnp.float32, -lim1, lim1)
    b1 = jax.random.uniform(k2, (1, hidden_dim), jnp.float32, -lim1, lim1)
    w2 = jax.random.uniform(k3, (hidden_dim, output_dim), jnp.float32, -lim2, lim2)
    b2 = jax.random.uniform(k4, (1, output_dim), jnp.float32, -lim2, lim2)
    # BatchNorm1d default init: gamma=1, beta=0, running_mean=0, running_var=1.
    gamma = jnp.ones((1, hidden_dim), jnp.float32)
    beta = jnp.zeros((1, hidden_dim), jnp.float32)
    mean = jnp.zeros((1, hidden_dim), jnp.float32)
    var = jnp.ones((1, hidden_dim), jnp.float32)
    return (w1, b1, gamma, beta, mean, var, w2, b2)


if __name__ == "__main__":
    INPUT_DIM = 32
    HIDDEN_DIM = 256   # matches TorchDNN default hidden_dim=[256]
    OUTPUT_DIM = 16
    BATCH = 8

    key = jax.random.PRNGKey(0)
    kx, kp = jax.random.split(key)
    x = jax.random.normal(kx, (BATCH, INPUT_DIM), jnp.float32)
    params = init_params(kp, INPUT_DIM, HIDDEN_DIM, OUTPUT_DIM)

    # One-time weight prep (off the per-call hot path).
    prepared, out_dim = prepare_params(params)
    prepared = jax.block_until_ready(prepared)

    try:
        out = jax.block_until_ready(
            torch_dnn_forward(x, prepared, out_dim=out_dim))
    except Exception:
        # Fallback for jax builds without BlockSpec pipeline_mode / pl.Buffered:
        # identical kernel, weights just double-buffered.
        out = jax.block_until_ready(
            torch_dnn_forward(x, prepared, out_dim=out_dim,
                              single_buffer_weights=False))
    assert out.shape == (BATCH, OUTPUT_DIM)

    # Reference in plain JAX with the same bf16 rounding / f32 accumulation.
    w1, b1, gamma, beta, mean, var, w2, b2 = params
    scale = gamma * jax.lax.rsqrt(var + BN_EPS)
    w1f = (w1 * scale).astype(jnp.bfloat16).astype(jnp.float32)
    b1f = (b1 - mean) * scale + beta
    xb = x.astype(jnp.bfloat16).astype(jnp.float32)
    h = jnp.maximum(xb @ w1f + b1f, 0.0)
    ref = h.astype(jnp.bfloat16).astype(jnp.float32) @ \
        w2.astype(jnp.bfloat16).astype(jnp.float32) + b2

    assert jnp.allclose(out, ref, atol=1e-3, rtol=1e-3), \
        float(jnp.max(jnp.abs(out - ref)))

    print("KERNEL_OK")
</pallas_src>

<mosaic_0001>
module attributes {stable_mosaic.version = 11 : i64} {
  func.func @dnn_kernel(%arg0: i32, %arg1: memref<16x32xf32, #tpu.memory_space<vmem>>, %arg2: memref<32x256xbf16, #tpu.memory_space<vmem>>, %arg3: memref<1x256xf32, #tpu.memory_space<vmem>>, %arg4: memref<256x128xbf16, #tpu.memory_space<vmem>>, %arg5: memref<1x128xf32, #tpu.memory_space<vmem>>, %arg6: memref<16x128xf32, #tpu.memory_space<vmem>>) attributes {dimension_semantics = [#tpu.dimension_semantics<parallel>], iteration_bounds = array<i64: 1>, scalar_prefetch = 0 : i64, scratch_operands = 0 : i64, tpu.core_type = #tpu.core_type<tc>, window_params = [{transform_indices = @transform_0, window_bounds = array<i64: 16, 32>}, {pipeline_mode = #tpu.pipeline_mode<synchronous>, transform_indices = @transform_1, window_bounds = array<i64: 32, 256>}, {pipeline_mode = #tpu.pipeline_mode<synchronous>, transform_indices = @transform_2, window_bounds = array<i64: 1, 256>}, {pipeline_mode = #tpu.pipeline_mode<synchronous>, transform_indices = @transform_3, window_bounds = array<i64: 256, 128>}, {pipeline_mode = #tpu.pipeline_mode<synchronous>, transform_indices = @transform_4, window_bounds = array<i64: 1, 128>}, {transform_indices = @transform_5, window_bounds = array<i64: 16, 128>}]} {
    %c0 = arith.constant 0 : index
    %c0_0 = arith.constant 0 : index
    %0 = vector.load %arg1[%c0, %c0_0] : memref<16x32xf32, #tpu.memory_space<vmem>>, vector<16x32xf32>
    %1 = arith.truncf %0 : vector<16x32xf32> to vector<16x32xbf16>
    %c0_1 = arith.constant 0 : index
    %c0_2 = arith.constant 0 : index
    %2 = vector.load %arg2[%c0_1, %c0_2] : memref<32x256xbf16, #tpu.memory_space<vmem>>, vector<32x256xbf16>
    %cst = arith.constant dense<0.000000e+00> : vector<16x256xf32>
    %3 = tpu.matmul %1, %2, %cst {dimension_numbers = #tpu.dot_dimension_numbers<[1], [0], [0], [1], [0, 0, 1, 1], [], []>} : vector<16x32xbf16>, vector<32x256xbf16>, vector<16x256xf32> -> vector<16x256xf32>
    %c0_3 = arith.constant 0 : index
    %c0_4 = arith.constant 0 : index
    %4 = vector.load %arg3[%c0_3, %c0_4] : memref<1x256xf32, #tpu.memory_space<vmem>>, vector<1x256xf32>
    %5 = vector.broadcast %4 : vector<1x256xf32> to vector<16x256xf32>
    %6 = arith.addf %3, %5 : vector<16x256xf32>
    %cst_5 = arith.constant 0.000000e+00 : f32
    %7 = vector.broadcast %cst_5 : f32 to vector<16x256xf32>
    %8 = arith.maximumf %6, %7 : vector<16x256xf32>
    %9 = arith.truncf %8 : vector<16x256xf32> to vector<16x256xbf16>
    %c0_6 = arith.constant 0 : index
    %c0_7 = arith.constant 0 : index
    %10 = vector.load %arg4[%c0_6, %c0_7] : memref<256x128xbf16, #tpu.memory_space<vmem>>, vector<256x128xbf16>
    %cst_8 = arith.constant dense<0.000000e+00> : vector<16x128xf32>
    %11 = tpu.matmul %9, %10, %cst_8 {dimension_numbers = #tpu.dot_dimension_numbers<[1], [0], [0], [1], [0, 0, 1, 1], [], []>} : vector<16x256xbf16>, vector<256x128xbf16>, vector<16x128xf32> -> vector<16x128xf32>
    %c0_9 = arith.constant 0 : index
    %c0_10 = arith.constant 0 : index
    %12 = vector.load %arg5[%c0_9, %c0_10] : memref<1x128xf32, #tpu.memory_space<vmem>>, vector<1x128xf32>
    %13 = vector.broadcast %12 : vector<1x128xf32> to vector<16x128xf32>
    %14 = arith.addf %11, %13 : vector<16x128xf32>
    %c0_11 = arith.constant 0 : index
    %c0_12 = arith.constant 0 : index
    %15 = vector.load %arg6[%c0_11, %c0_12] : memref<16x128xf32, #tpu.memory_space<vmem>>, vector<16x128xf32>
    tpu.vector_store %arg6[%c0_11, %c0_12], %14 {strides = array<i32>} : memref<16x128xf32, #tpu.memory_space<vmem>>, vector<16x128xf32>,
    return
  }
  func.func @transform_0(%arg0: i32) -> (i32, i32) {
    %c0_i32 = arith.constant 0 : i32
    %c0_i32_0 = arith.constant 0 : i32
    return %arg0, %c0_i32 : i32, i32
  }
  func.func @transform_1(%arg0: i32) -> (i32, i32) {
    %c0_i32 = arith.constant 0 : i32
    %c0_i32_0 = arith.constant 0 : i32
    %c0_i32_1 = arith.constant 0 : i32
    return %c0_i32, %c0_i32_0 : i32, i32
  }
  func.func @transform_2(%arg0: i32) -> (i32, i32) {
    %c0_i32 = arith.constant 0 : i32
    %c0_i32_0 = arith.constant 0 : i32
    %c0_i32_1 = arith.constant 0 : i32
    return %c0_i32, %c0_i32_0 : i32, i32
  }
  func.func @transform_3(%arg0: i32) -> (i32, i32) {
    %c0_i32 = arith.constant 0 : i32
    %c0_i32_0 = arith.constant 0 : i32
    %c0_i32_1 = arith.constant 0 : i32
    return %c0_i32, %c0_i32_0 : i32, i32
  }
  func.func @transform_4(%arg0: i32) -> (i32, i32) {
    %c0_i32 = arith.constant 0 : i32
    %c0_i32_0 = arith.constant 0 : i32
    %c0_i32_1 = arith.constant 0 : i32
    return %c0_i32, %c0_i32_0 : i32, i32
  }
  func.func @transform_5(%arg0: i32) -> (i32, i32) {
    %c0_i32 = arith.constant 0 : i32
    %c0_i32_0 = arith.constant 0 : i32
    return %arg0, %c0_i32 : i32, i32
  }
}

module attributes {stable_mosaic.version = 11 : i64} {
  func.func @dnn_kernel(%arg0: i32, %arg1: memref<16x32xf32, #tpu.memory_space<vmem>>, %arg2: memref<32x256xbf16, #tpu.memory_space<vmem>>, %arg3: memref<1x256xf32, #tpu.memory_space<vmem>>, %arg4: memref<256x128xbf16, #tpu.memory_space<vmem>>, %arg5: memref<1x128xf32, #tpu.memory_space<vmem>>, %arg6: memref<16x128xf32, #tpu.memory_space<vmem>>) attributes {dimension_semantics = [#tpu.dimension_semantics<parallel>], iteration_bounds = array<i64: 1>, scalar_prefetch = 0 : i64, scratch_operands = 0 : i64, tpu.core_type = #tpu.core_type<tc>, window_params = [{transform_indices = @transform_0, window_bounds = array<i64: 16, 32>}, {pipeline_mode = #tpu.pipeline_mode<synchronous>, transform_indices = @transform_1, window_bounds = array<i64: 32, 256>}, {pipeline_mode = #tpu.pipeline_mode<synchronous>, transform_indices = @transform_2, window_bounds = array<i64: 1, 256>}, {pipeline_mode = #tpu.pipeline_mode<synchronous>, transform_indices = @transform_3, window_bounds = array<i64: 256, 128>}, {pipeline_mode = #tpu.pipeline_mode<synchronous>, transform_indices = @transform_4, window_bounds = array<i64: 1, 128>}, {transform_indices = @transform_5, window_bounds = array<i64: 16, 128>}]} {
    %c0 = arith.constant 0 : index
    %c0_0 = arith.constant 0 : index
    %0 = vector.load %arg1[%c0, %c0_0] : memref<16x32xf32, #tpu.memory_space<vmem>>, vector<16x32xf32>
    %1 = arith.truncf %0 : vector<16x32xf32> to vector<16x32xbf16>
    %c0_1 = arith.constant 0 : index
    %c0_2 = arith.constant 0 : index
    %2 = vector.load %arg2[%c0_1, %c0_2] : memref<32x256xbf16, #tpu.memory_space<vmem>>, vector<32x256xbf16>
    %cst = arith.constant dense<0.000000e+00> : vector<16x256xf32>
    %3 = tpu.matmul %1, %2, %cst {dimension_numbers = #tpu.dot_dimension_numbers<[1], [0], [0], [1], [0, 0, 1, 1], [], []>} : vector<16x32xbf16>, vector<32x256xbf16>, vector<16x256xf32> -> vector<16x256xf32>
    %c0_3 = arith.constant 0 : index
    %c0_4 = arith.constant 0 : index
    %4 = vector.load %arg3[%c0_3, %c0_4] : memref<1x256xf32, #tpu.memory_space<vmem>>, vector<1x256xf32>
    %5 = vector.broadcast %4 : vector<1x256xf32> to vector<16x256xf32>
    %6 = arith.addf %3, %5 : vector<16x256xf32>
    %cst_5 = arith.constant 0.000000e+00 : f32
    %7 = vector.broadcast %cst_5 : f32 to vector<16x256xf32>
    %8 = arith.maximumf %6, %7 : vector<16x256xf32>
    %9 = arith.truncf %8 : vector<16x256xf32> to vector<16x256xbf16>
    %c0_6 = arith.constant 0 : index
    %c0_7 = arith.constant 0 : index
    %10 = vector.load %arg4[%c0_6, %c0_7] : memref<256x128xbf16, #tpu.memory_space<vmem>>, vector<256x128xbf16>
    %cst_8 = arith.constant dense<0.000000e+00> : vector<16x128xf32>
    %11 = tpu.matmul %9, %10, %cst_8 {dimension_numbers = #tpu.dot_dimension_numbers<[1], [0], [0], [1], [0, 0, 1, 1], [], []>} : vector<16x256xbf16>, vector<256x128xbf16>, vector<16x128xf32> -> vector<16x128xf32>
    %c0_9 = arith.constant 0 : index
    %c0_10 = arith.constant 0 : index
    %12 = vector.load %arg5[%c0_9, %c0_10] : memref<1x128xf32, #tpu.memory_space<vmem>>, vector<1x128xf32>
    %13 = vector.broadcast %12 : vector<1x128xf32> to vector<16x128xf32>
    %14 = arith.addf %11, %13 : vector<16x128xf32>
    %c0_11 = arith.constant 0 : index
    %c0_12 = arith.constant 0 : index
    %15 = vector.load %arg6[%c0_11, %c0_12] : memref<16x128xf32, #tpu.memory_space<vmem>>, vector<16x128xf32>
    tpu.vector_store %arg6[%c0_11, %c0_12], %14 {strides = array<i32>} : memref<16x128xf32, #tpu.memory_space<vmem>>, vector<16x128xf32>,
    return
  }
  func.func @transform_0(%arg0: i32) -> (i32, i32) {
    %c0_i32 = arith.constant 0 : i32
    %c0_i32_0 = arith.constant 0 : i32
    return %arg0, %c0_i32 : i32, i32
  }
  func.func @transform_1(%arg0: i32) -> (i32, i32) {
    %c0_i32 = arith.constant 0 : i32
    %c0_i32_0 = arith.constant 0 : i32
    %c0_i32_1 = arith.constant 0 : i32
    return %c0_i32, %c0_i32_0 : i32, i32
  }
  func.func @transform_2(%arg0: i32) -> (i32, i32) {
    %c0_i32 = arith.constant 0 : i32
    %c0_i32_0 = arith.constant 0 : i32
    %c0_i32_1 = arith.constant 0 : i32
    return %c0_i32, %c0_i32_0 : i32, i32
  }
  func.func @transform_3(%arg0: i32) -> (i32, i32) {
    %c0_i32 = arith.constant 0 : i32
    %c0_i32_0 = arith.constant 0 : i32
    %c0_i32_1 = arith.constant 0 : i32
    return %c0_i32, %c0_i32_0 : i32, i32
  }
  func.func @transform_4(%arg0: i32) -> (i32, i32) {
    %c0_i32 = arith.constant 0 : i32
    %c0_i32_0 = arith.constant 0 : i32
    %c0_i32_1 = arith.constant 0 : i32
    return %c0_i32, %c0_i32_0 : i32, i32
  }
  func.func @transform_5(%arg0: i32) -> (i32, i32) {
    %c0_i32 = arith.constant 0 : i32
    %c0_i32_0 = arith.constant 0 : i32
    return %arg0, %c0_i32 : i32, i32
  }
}

</mosaic_0001>

<bundles_post_ra>
// kernel: torch_dnn_forward.1
= control target key start
LH: loop header
LB: loop body
LE: loop exit
PB: predicated region body
PF: predicated region fallthrough
CT: control target
= control target key end

     0   :  { %10 = vsyncpa [#allocation3], 0  ;;  %s513_s0 = inlined_call_operand.vmem [shape: f32[16,32], index: 0, kind: input, shape index: {}]   ;;  %s514_s1 = inlined_call_operand.hbm [shape: bf16[32,256], index: 1, kind: input, shape index: {}]   ;;  %s515_s2 = inlined_call_operand.vmem [shape: f32[1,256], index: 2, kind: input, shape index: {}]   ;;  %s516_s3 = inlined_call_operand.hbm [shape: bf16[256,128], index: 3, kind: input, shape index: {}]   ;;  %s517_s4 = inlined_call_operand.vmem [shape: f32[1,128], index: 4, kind: input, shape index: {}]   ;;  %s518_s5 = inlined_call_operand.vmem [shape: f32[16,128], index: 5, kind: output, shape index: {}]  }
   0x1   :  { %s18_s20 = sshll.u32 %s514_s1, 4  ;;  %s19_s20 = int_to_ptr.hbm [resolvable:$true] %s18_s20 }
   0x2   :  { %11 = vsyncpa [#allocation5], 0  ;;  %s453_s21 = smov [#allocation2]   ;;  %s33_s25 = sshll.u32 %s516_s3, 4  ;;  %s34_s25 = int_to_ptr.hbm [resolvable:$true] %s33_s25 }
   0x3   :  { %s20_s22 = sshll.u32 %s453_s21, 4  ;;  %s454_s26 = smov 128   ;;  %s21_s22 = int_to_ptr.vmem [resolvable:$true] %s20_s22 }
   0x4   :  { %s455_s27 = smov 8   ;;  %s456_s28 = smov [#allocation4]  }
   0x5   :  { %26 = dma.hbm_to_vmem [thread:$0]  %s19_s20, 512, %s21_s22, [#allocation3], %s454_s26, %s454_s26, %s455_s27  }
   0x6   :  { %s35_s29 = sshll.u32 %s456_s28, 4  ;;  %s457_s30 = smov 64   ;;  %s36_s29 = int_to_ptr.vmem [resolvable:$true] %s35_s29 }
   0x7   :  { %s458_s6 = smov 4  }
   0x8   :  { %41 = dma.hbm_to_vmem [thread:$0]  %s34_s25, 2048, %s36_s29, [#allocation5], %s457_s30, %s457_s30, %s458_s6  }
   0x9   :  { %449 = dma.done.wait [#allocation3], 512  }
   0xa   :  { %450 = vsyncadd [#allocation3], 4294966784 }
   0xb   :  { %451 = dma.done.wait [#allocation5], 2048  }
   0xc   :  { %452 = vsyncadd [#allocation5], 4294965248  ;;  %v302_v0 = vld [vmem:[#allocation2 + $0x10] sm:$0xf]  ;;  %v377_v1 = vld [vmem:[#allocation2 + $0x14] sm:$0xf0] }
   0xd   :  { %v376_v2 = vld [vmem:[#allocation2 + $0x14] sm:$0xf]  ;;  %v303_v3 = vor.u32 %v377_v1, %v302_v0  ;;  %v304_v4 = vld [vmem:[#allocation2 + $0x18] sm:$0xf0]  ;;  %v294_v5 = vld [vmem:[#allocation2] sm:$0xf] }
   0xe   :  { %v375_v6 = vld [vmem:[#allocation2 + $0x4] sm:$0xf0]  ;;  %v307_v7 = vor.u32 %v376_v2, %v304_v4  ;;  %v374_v8 = vld [vmem:[#allocation2 + $0x4] sm:$0xf]  ;;  %v296_v9 = vld [vmem:[#allocation2 + $0x8] sm:$0xf0] }
   0xf   :  { %v53_v10 = vld [vmem:[%s513_s0] sm:$0xff]  ;;  %96 = vmatpush.bf16.msra.mxu0 %v303_v3  ;;  %v295_v11 = vor.u32 %v375_v6, %v294_v5  ;;  %v54_v12 = vld [vmem:[%s513_s0 + $0x8] sm:$0xff]  ;;  %v385_v13 = vld [vmem:[#allocation4 + $0x38] sm:$0xff]  ;;  %v299_v15 = vor.u32 %v374_v8, %v296_v9  ;;  %vm86_vm0 = vcmask 261120  }
  0x10   :  { %v393_v14 = vld [vmem:[#allocation4 + $0x78] sm:$0xff]  ;;  %110 = vmatpush.bf16.msra.mxu1 %v307_v7  ;;  %256 = vmatpush.bf16.msra.mxu2 %v385_v13  ;;  %v384_v16 = vld [vmem:[#allocation4 + $0x30] sm:$0xff]  ;;  %v55_v18 = vpack.c.bf16 %v54_v12, %v53_v10  ;;  %v383_v19 = vld [vmem:[#allocation4 + $0x28] sm:$0xff] }
  0x11   :  { %270 = vmatpush.bf16.msra.mxu3 %v393_v14  ;;  %v392_v17 = vld [vmem:[#allocation4 + $0x70] sm:$0xff]  ;;  %v391_v20 = vld [vmem:[#allocation4 + $0x68] sm:$0xff]  ;;  %v382_v21 = vld [vmem:[#allocation4 + $0x20] sm:$0xff] }
  0x12   :  { %v390_v22 = vld [vmem:[#allocation4 + $0x60] sm:$0xff]  ;;  %v381_v23 = vld [vmem:[#allocation4 + $0x18] sm:$0xff]  ;;  %v380_v25 = vld [vmem:[#allocation4 + $0x10] sm:$0xff] }
  0x13   :  { %97 = vmatpush.bf16.msra.mxu0 %v295_v11  ;;  %v389_v24 = vld [vmem:[#allocation4 + $0x58] sm:$0xff]  ;;  %v388_v26 = vld [vmem:[#allocation4 + $0x50] sm:$0xff]  ;;  %v379_v27 = vld [vmem:[#allocation4 + $0x8] sm:$0xff] }
  0x14   :  { %111 = vmatpush.bf16.msra.mxu1 %v299_v15  ;;  %257 = vmatpush.bf16.msra.mxu2 %v384_v16  ;;  %v387_v28 = vld [vmem:[#allocation4 + $0x48] sm:$0xff]  ;;  %v378_v29 = vld [vmem:[#allocation4] sm:$0xff] }
  0x15   :  { %271 = vmatpush.bf16.msra.mxu3 %v392_v17  ;;  %v386_v30 = vld [vmem:[#allocation4 + $0x40] sm:$0xff] }
  0x16   :  { %308 = vmatmul.msk.bf16.vlgmr.msra.gmra.mxu0 %vm86_vm0, %v55_v18  ;;  %v60_v31 = vld [vmem:[%s515_s2] sm:$0x3] }
  0x17   :  { %309 = vmatmul.msk.bf16.vlgmr.msra.gmra.mxu1 %vm86_vm0, %v55_v18  ;;  %v62_v34 = vperm.slane %v60_v31, 0  ;;  %v63_v35 = vperm.slane %v60_v31, 1  ;;  %v400_v48 = vld [vmem:[%s517_s4] ss:$0 sm:$0xff] }
  0x18   :  { %258 = vmatpush.bf16.msra.mxu2 %v383_v19 }
  0x19   :  { %272 = vmatpush.bf16.msra.mxu3 %v391_v20 }
  0x1c   :  { %259 = vmatpush.bf16.msra.mxu2 %v382_v21 }
  0x1d   :  { %273 = vmatpush.bf16.msra.mxu3 %v390_v22 }
  0x20   :  { %260 = vmatpush.bf16.msra.mxu2 %v381_v23 }
  0x21   :  { %274 = vmatpush.bf16.msra.mxu3 %v389_v24 }
  0x24   :  { %261 = vmatpush.bf16.msra.mxu2 %v380_v25 }
  0x25   :  { %275 = vmatpush.bf16.msra.mxu3 %v388_v26 }
  0x28   :  { %262 = vmatpush.bf16.msra.mxu2 %v379_v27 }
  0x29   :  { %276 = vmatpush.bf16.msra.mxu3 %v387_v28 }
  0x2c   :  { %263 = vmatpush.bf16.msra.mxu2 %v378_v29 }
  0x2d   :  { %277 = vmatpush.bf16.msra.mxu3 %v386_v30 }
  0x93   :  { %v99_v32 = vpop.f32.mrf.mxu0 }
  0x94   :  { %v113_v33 = vpop.f32.mrf.mxu1  ;;  %v100_v36 = vadd.f32 %v99_v32, %v62_v34 }
  0x95   :  { %v114_v37 = vadd.f32 %v113_v33, %v63_v35 }
  0x96   :  { %v118_v42 = vmax.f32 %v100_v36, 0.0 }
  0x97   :  { %v119_v44 = vmax.f32 %v114_v37, 0.0 }
  0x9b   :  { %v101_v38 = vpop.f32.mrf.mxu0 }
  0x9c   :  { %v102_v39 = vadd.f32 %v101_v38, %v62_v34  ;;  %v115_v40 = vpop.f32.mrf.mxu1 }
  0x9d   :  { %v116_v41 = vadd.f32 %v115_v40, %v63_v35 }
  0x9e   :  { %v120_v43 = vmax.f32 %v102_v39, 0.0 }
  0x9f   :  { %v121_v45 = vmax.f32 %v116_v41, 0.0 }
  0xa0   :  { %v122_v46 = vpack.c.bf16 %v120_v43, %v118_v42 }
  0xa1   :  { %v123_v47 = vpack.c.bf16 %v121_v45, %v119_v44 }
  0xa2   :  { %264 = vmatmul.bf16.vlgmr.msra.gmra.mxu2 %v122_v46 }
  0xa3   :  { %278 = vmatmul.bf16.vlgmr.msra.gmra.mxu3 %v123_v47 }
 0x125   :  { %v265_v49 = vpop.f32.mrf.mxu2 }
 0x126   :  { %v266_v50 = vadd.f32 %v400_v48, %v265_v49  ;;  %v279_v51 = vpop.f32.mrf.mxu3 }
 0x128   :  { %v280_v52 = vadd.f32 %v279_v51, %v266_v50 }
 0x12a   :  { %284 = vst [vmem:[%s518_s5] sm:$0xff] %v280_v52 }
 0x12d   :  { %v267_v53 = vpop.f32.mrf.mxu2 }
 0x12e   :  { %v268_v54 = vadd.f32 %v400_v48, %v267_v53  ;;  %v281_v55 = vpop.f32.mrf.mxu3 }
 0x130   :  { %v282_v56 = vadd.f32 %v281_v55, %v268_v54 }
 0x132   :  { %285 = vst [vmem:[%s518_s5 + $0x8] sm:$0xff] %v282_v56 }
 0x133   :  { %290 = vsyncpa [#allocation3], 1 }
 0x134   :  { %291 = vsyncpa [#allocation5], 1 }

// kernel: torch_dnn_forward.1
= control target key start
LH: loop header
LB: loop body
LE: loop exit
PB: predicated region body
PF: predicated region fallthrough
CT: control target
= control target key end

     0   :  { %10 = vsyncpa [#allocation3], 0  ;;  %s513_s0 = inlined_call_operand.vmem [shape: f32[16,32], index: 0, kind: input, shape index: {}]   ;;  %s514_s1 = inlined_call_operand.hbm [shape: bf16[32,256], index: 1, kind: input, shape index: {}]   ;;  %s515_s2 = inlined_call_operand.vmem [shape: f32[1,256], index: 2, kind: input, shape index: {}]   ;;  %s516_s3 = inlined_call_operand.hbm [shape: bf16[256,128], index: 3, kind: input, shape index: {}]   ;;  %s517_s4 = inlined_call_operand.vmem [shape: f32[1,128], index: 4, kind: input, shape index: {}]   ;;  %s518_s5 = inlined_call_operand.vmem [shape: f32[16,128], index: 5, kind: output, shape index: {}]  }
   0x1   :  { %s18_s20 = sshll.u32 %s514_s1, 4  ;;  %s19_s20 = int_to_ptr.hbm [resolvable:$true] %s18_s20 }
   0x2   :  { %11 = vsyncpa [#allocation5], 0  ;;  %s453_s21 = smov [#allocation2]   ;;  %s33_s25 = sshll.u32 %s516_s3, 4  ;;  %s34_s25 = int_to_ptr.hbm [resolvable:$true] %s33_s25 }
   0x3   :  { %s20_s22 = sshll.u32 %s453_s21, 4  ;;  %s454_s26 = smov 128   ;;  %s21_s22 = int_to_ptr.vmem [resolvable:$true] %s20_s22 }
   0x4   :  { %s455_s27 = smov 8   ;;  %s456_s28 = smov [#allocation4]  }
   0x5   :  { %26 = dma.hbm_to_vmem [thread:$0]  %s19_s20, 512, %s21_s22, [#allocation3], %s454_s26, %s454_s26, %s455_s27  }
   0x6   :  { %s35_s29 = sshll.u32 %s456_s28, 4  ;;  %s457_s30 = smov 64   ;;  %s36_s29 = int_to_ptr.vmem [resolvable:$true] %s35_s29 }
   0x7   :  { %s458_s6 = smov 4  }
   0x8   :  { %41 = dma.hbm_to_vmem [thread:$0]  %s34_s25, 2048, %s36_s29, [#allocation5], %s457_s30, %s457_s30, %s458_s6  }
   0x9   :  { %449 = dma.done.wait [#allocation3], 512  }
   0xa   :  { %450 = vsyncadd [#allocation3], 4294966784 }
   0xb   :  { %451 = dma.done.wait [#allocation5], 2048  }
   0xc   :  { %452 = vsyncadd [#allocation5], 4294965248  ;;  %v302_v0 = vld [vmem:[#allocation2 + $0x10] sm:$0xf]  ;;  %v377_v1 = vld [vmem:[#allocation2 + $0x14] sm:$0xf0] }
   0xd   :  { %v376_v2 = vld [vmem:[#allocation2 + $0x14] sm:$0xf]  ;;  %v303_v3 = vor.u32 %v377_v1, %v302_v0  ;;  %v304_v4 = vld [vmem:[#allocation2 + $0x18] sm:$0xf0]  ;;  %v294_v5 = vld [vmem:[#allocation2] sm:$0xf] }
   0xe   :  { %v375_v6 = vld [vmem:[#allocation2 + $0x4] sm:$0xf0]  ;;  %v307_v7 = vor.u32 %v376_v2, %v304_v4  ;;  %v374_v8 = vld [vmem:[#allocation2 + $0x4] sm:$0xf]  ;;  %v296_v9 = vld [vmem:[#allocation2 + $0x8] sm:$0xf0] }
   0xf   :  { %v53_v10 = vld [vmem:[%s513_s0] sm:$0xff]  ;;  %96 = vmatpush.bf16.msra.mxu0 %v303_v3  ;;  %v295_v11 = vor.u32 %v375_v6, %v294_v5  ;;  %v54_v12 = vld [vmem:[%s513_s0 + $0x8] sm:$0xff]  ;;  %v385_v13 = vld [vmem:[#allocation4 + $0x38] sm:$0xff]  ;;  %v299_v15 = vor.u32 %v374_v8, %v296_v9  ;;  %vm86_vm0 = vcmask 261120  }
  0x10   :  { %v393_v14 = vld [vmem:[#allocation4 + $0x78] sm:$0xff]  ;;  %110 = vmatpush.bf16.msra.mxu1 %v307_v7  ;;  %256 = vmatpush.bf16.msra.mxu2 %v385_v13  ;;  %v384_v16 = vld [vmem:[#allocation4 + $0x30] sm:$0xff]  ;;  %v55_v18 = vpack.c.bf16 %v54_v12, %v53_v10  ;;  %v383_v19 = vld [vmem:[#allocation4 + $0x28] sm:$0xff] }
  0x11   :  { %270 = vmatpush.bf16.msra.mxu3 %v393_v14  ;;  %v392_v17 = vld [vmem:[#allocation4 + $0x70] sm:$0xff]  ;;  %v391_v20 = vld [vmem:[#allocation4 + $0x68] sm:$0xff]  ;;  %v382_v21 = vld [vmem:[#allocation4 + $0x20] sm:$0xff] }
  0x12   :  { %v390_v22 = vld [vmem:[#allocation4 + $0x60] sm:$0xff]  ;;  %v381_v23 = vld [vmem:[#allocation4 + $0x18] sm:$0xff]  ;;  %v380_v25 = vld [vmem:[#allocation4 + $0x10] sm:$0xff] }
  0x13   :  { %97 = vmatpush.bf16.msra.mxu0 %v295_v11  ;;  %v389_v24 = vld [vmem:[#allocation4 + $0x58] sm:$0xff]  ;;  %v388_v26 = vld [vmem:[#allocation4 + $0x50] sm:$0xff]  ;;  %v379_v27 = vld [vmem:[#allocation4 + $0x8] sm:$0xff] }
  0x14   :  { %111 = vmatpush.bf16.msra.mxu1 %v299_v15  ;;  %257 = vmatpush.bf16.msra.mxu2 %v384_v16  ;;  %v387_v28 = vld [vmem:[#allocation4 + $0x48] sm:$0xff]  ;;  %v378_v29 = vld [vmem:[#allocation4] sm:$0xff] }
  0x15   :  { %271 = vmatpush.bf16.msra.mxu3 %v392_v17  ;;  %v386_v30 = vld [vmem:[#allocation4 + $0x40] sm:$0xff] }
  0x16   :  { %308 = vmatmul.msk.bf16.vlgmr.msra.gmra.mxu0 %vm86_vm0, %v55_v18  ;;  %v60_v31 = vld [vmem:[%s515_s2] sm:$0x3] }
  0x17   :  { %309 = vmatmul.msk.bf16.vlgmr.msra.gmra.mxu1 %vm86_vm0, %v55_v18  ;;  %v62_v34 = vperm.slane %v60_v31, 0  ;;  %v63_v35 = vperm.slane %v60_v31, 1  ;;  %v400_v48 = vld [vmem:[%s517_s4] ss:$0 sm:$0xff] }
  0x18   :  { %258 = vmatpush.bf16.msra.mxu2 %v383_v19 }
  0x19   :  { %272 = vmatpush.bf16.msra.mxu3 %v391_v20 }
  0x1c   :  { %259 = vmatpush.bf16.msra.mxu2 %v382_v21 }
  0x1d   :  { %273 = vmatpush.bf16.msra.mxu3 %v390_v22 }
  0x20   :  { %260 = vmatpush.bf16.msra.mxu2 %v381_v23 }
  0x21   :  { %274 = vmatpush.bf16.msra.mxu3 %v389_v24 }
  0x24   :  { %261 = vmatpush.bf16.msra.mxu2 %v380_v25 }
  0x25   :  { %275 = vmatpush.bf16.msra.mxu3 %v388_v26 }
  0x28   :  { %262 = vmatpush.bf16.msra.mxu2 %v379_v27 }
  0x29   :  { %276 = vmatpush.bf16.msra.mxu3 %v387_v28 }
  0x2c   :  { %263 = vmatpush.bf16.msra.mxu2 %v378_v29 }
  0x2d   :  { %277 = vmatpush.bf16.msra.mxu3 %v386_v30 }
  0x93   :  { %v99_v32 = vpop.f32.mrf.mxu0 }
  0x94   :  { %v113_v33 = vpop.f32.mrf.mxu1  ;;  %v100_v36 = vadd.f32 %v99_v32, %v62_v34 }
  0x95   :  { %v114_v37 = vadd.f32 %v113_v33, %v63_v35 }
  0x96   :  { %v118_v42 = vmax.f32 %v100_v36, 0.0 }
  0x97   :  { %v119_v44 = vmax.f32 %v114_v37, 0.0 }
  0x9b   :  { %v101_v38 = vpop.f32.mrf.mxu0 }
  0x9c   :  { %v102_v39 = vadd.f32 %v101_v38, %v62_v34  ;;  %v115_v40 = vpop.f32.mrf.mxu1 }
  0x9d   :  { %v116_v41 = vadd.f32 %v115_v40, %v63_v35 }
  0x9e   :  { %v120_v43 = vmax.f32 %v102_v39, 0.0 }
  0x9f   :  { %v121_v45 = vmax.f32 %v116_v41, 0.0 }
  0xa0   :  { %v122_v46 = vpack.c.bf16 %v120_v43, %v118_v42 }
  0xa1   :  { %v123_v47 = vpack.c.bf16 %v121_v45, %v119_v44 }
  0xa2   :  { %264 = vmatmul.bf16.vlgmr.msra.gmra.mxu2 %v122_v46 }
  0xa3   :  { %278 = vmatmul.bf16.vlgmr.msra.gmra.mxu3 %v123_v47 }
 0x125   :  { %v265_v49 = vpop.f32.mrf.mxu2 }
 0x126   :  { %v266_v50 = vadd.f32 %v400_v48, %v265_v49  ;;  %v279_v51 = vpop.f32.mrf.mxu3 }
 0x128   :  { %v280_v52 = vadd.f32 %v279_v51, %v266_v50 }
 0x12a   :  { %284 = vst [vmem:[%s518_s5] sm:$0xff] %v280_v52 }
 0x12d   :  { %v267_v53 = vpop.f32.mrf.mxu2 }
 0x12e   :  { %v268_v54 = vadd.f32 %v400_v48, %v267_v53  ;;  %v281_v55 = vpop.f32.mrf.mxu3 }
 0x130   :  { %v282_v56 = vadd.f32 %v281_v55, %v268_v54 }
 0x132   :  { %285 = vst [vmem:[%s518_s5 + $0x8] sm:$0xff] %v282_v56 }
 0x133   :  { %290 = vsyncpa [#allocation3], 1 }
 0x134   :  { %291 = vsyncpa [#allocation5], 1 }

</bundles_post_ra>
